<compile_context>
chip_gen: v7x
topology: tpu7x:2x2x1
jax: 0.10.0
libtpu: 0.0.40
codegen_flags: <defaults>
</compile_context>

<pallas_src>
import jax
import jax.numpy as jnp
from jax import lax
from jax.experimental import pallas as pl
from jax.experimental.pallas import tpu as pltpu


_LANES = 128
_SUBLANES = 8
_GROUP = _LANES * _SUBLANES          # 1024: element granularity of the kernel path
_MAX_BLOCK_ROWS = 2048               # (2048,128) f32 = 1 MiB / input / pipeline buffer


def _round_up(x: int, m: int) -> int:
    return ((x + m - 1) // m) * m


def _neg_logsigmoid(z):
    # -logsigmoid(z) == softplus(-z), numerically stable form.
    return jnp.maximum(-z, 0.0) + jnp.log1p(jnp.exp(-jnp.abs(z)))


def _make_kernel(inner: int, block_rows: int, n_valid: int):
    """Kernel producing per-core (8,128) partial sums of -logsigmoid(beta*logits)."""

    def kernel(beta_ref, pc_ref, pr_ref, rc_ref, rr_ref, out_ref):
        i = pl.program_id(0)          # core (parallel) axis
        j = pl.program_id(1)          # sequential reduction axis

        @pl.when(j == 0)
        def _init():
            out_ref[...] = jnp.zeros_like(out_ref)

        beta = beta_ref[0]
        z = beta * ((pc_ref[...] - rc_ref[...]) - (pr_ref[...] - rr_ref[...]))
        losses = _neg_logsigmoid(z)   # (block_rows, 128) f32

        def accumulate(vals):
            # Regroup into whole (8,128) vregs and sum along the leading axis:
            # pure VPU vreg adds into the resident output block, no XLU.
            out_ref[...] += vals.reshape(-1, _SUBLANES, _LANES).sum(axis=0)

        # Only trailing block(s) can contain padded / out-of-bounds rows.
        # NOTE: int32 flat indices overflow above ~2.1e9 elements - far beyond
        # any realistic DPO batch size.
        g = i * inner + j                                     # global block index
        needs_mask = (g + 1) * (block_rows * _LANES) > n_valid

        @pl.when(jnp.logical_not(needs_mask))
        def _steady():                                        # no mask cost here
            accumulate(losses)

        @pl.when(needs_mask)
        def _masked():
            row = lax.broadcasted_iota(jnp.int32, losses.shape, 0)
            lane = lax.broadcasted_iota(jnp.int32, losses.shape, 1)
            flat = (g * block_rows + row) * _LANES + lane
            accumulate(jnp.where(flat < n_valid, losses, 0.0))

    return kernel


def _dpo_partial_sum(beta_arr, pc2, pr2, rc2, rr2, *, rows, n_valid, max_block_rows):
    """Launch the kernel on (rows, 128)-shaped inputs; returns sum of valid losses."""
    blocks_ideal = max(1, pl.cdiv(rows, max(1, max_block_rows)))
    n_cores = 2 if blocks_ideal >= 2 else 1      # use both TensorCores on v7x
    blocks = _round_up(blocks_ideal, n_cores)
    block_rows = _round_up(pl.cdiv(rows, blocks), _SUBLANES)
    inner = blocks // n_cores
    last_block = pl.cdiv(rows, block_rows) - 1   # clamp target for empty trailing blocks

    def vec_index(i, j):
        # Clamp so an (all-masked) empty trailing block re-reads a valid block
        # instead of indexing past the array.
        return (jnp.minimum(i * inner + j, last_block), 0)

    vec_spec = pl.BlockSpec((block_rows, _LANES), vec_index)
    smem_spec = pl.BlockSpec(memory_space=pltpu.MemorySpace.SMEM)

    out = pl.pallas_call(
        _make_kernel(inner, block_rows, n_valid),
        out_shape=jax.ShapeDtypeStruct((n_cores * _SUBLANES, _LANES), jnp.float32),
        grid=(n_cores, inner),
        in_specs=[smem_spec, vec_spec, vec_spec, vec_spec, vec_spec],
        out_specs=pl.BlockSpec((_SUBLANES, _LANES), lambda i, j: (i, 0)),
        compiler_params=pltpu.CompilerParams(
            dimension_semantics=("parallel", "arbitrary"),
            vmem_limit_bytes=32 << 20,
        ),
    )(beta_arr, pc2, pr2, rc2, rr2)
    return jnp.sum(out)                          # tiny (n_cores*8, 128) reduce


def dpo_loss(policy_chosen_logps,
             policy_rejected_logps,
             reference_chosen_logps,
             reference_rejected_logps,
             beta: float = 0.1,
             max_block_rows: int = _MAX_BLOCK_ROWS):
    """Pallas TPU implementation of DPOLoss.forward. Returns a scalar f32."""
    # TODO(synk): accept bf16 log-probs without the f32 upcast (halves HBM
    # traffic on this purely bandwidth-bound op) once bf16 loss precision is OK.
    pc = jnp.asarray(policy_chosen_logps, jnp.float32).reshape(-1)
    pr = jnp.asarray(policy_rejected_logps, jnp.float32).reshape(-1)
    rc = jnp.asarray(reference_chosen_logps, jnp.float32).reshape(-1)
    rr = jnp.asarray(reference_rejected_logps, jnp.float32).reshape(-1)
    n = pc.shape[0]
    beta_arr = jnp.full((1,), beta, dtype=jnp.float32)

    if n >= _GROUP:
        # Bulk path: copy-free (bitcast) reshape of the 1024-divisible prefix.
        n_main = (n // _GROUP) * _GROUP
        rows = n_main // _LANES

        def as_rows(x):
            if n_main != n:
                x = x[:n_main]
            return x.reshape(rows, _LANES)

        main_sum = _dpo_partial_sum(beta_arr, as_rows(pc), as_rows(pr),
                                    as_rows(rc), as_rows(rr),
                                    rows=rows, n_valid=n_main,
                                    max_block_rows=max_block_rows)
        if n_main != n:
            # <1024-element ragged tail: negligible work, plain JAX.
            zt = beta_arr[0] * ((pc[n_main:] - rc[n_main:]) - (pr[n_main:] - rr[n_main:]))
            tail_sum = jnp.sum(_neg_logsigmoid(zt))
        else:
            tail_sum = jnp.float32(0.0)
        total = main_sum + tail_sum
    else:
        # Tiny batch: pad to a single (8,128) tile (<= 4 KiB/input, negligible)
        # so the kernel still handles it; padded elements are masked in-kernel.
        def padded(x):
            return jnp.pad(x, (0, _GROUP - n)).reshape(_SUBLANES, _LANES)

        total = _dpo_partial_sum(beta_arr, padded(pc), padded(pr),
                                 padded(rc), padded(rr),
                                 rows=_SUBLANES, n_valid=n,
                                 max_block_rows=max_block_rows)

    return total / n


def _dpo_loss_ref(pc, pr, rc, rr, beta=0.1):
    logits = (pc - rc) - (pr - rr)
    return jnp.mean(-jax.nn.log_sigmoid(beta * logits))


if __name__ == "__main__":
    key = jax.random.PRNGKey(0)

    def make_inputs(k, batch):
        ks = jax.random.split(k, 4)
        return tuple(-jnp.abs(jax.random.normal(kk, (batch,), jnp.float32)) * 2.0
                     for kk in ks)

    # Case A: tiny batch (< 1024) -> single (8,128) tile, element-masked.
    k, key = jax.random.split(key)
    pc, pr, rc, rr = make_inputs(k, 300)
    loss = jax.block_until_ready(dpo_loss(pc, pr, rc, rr, beta=0.1))
    ref = _dpo_loss_ref(pc, pr, rc, rr, beta=0.1)
    assert jnp.allclose(loss, ref, atol=1e-5, rtol=1e-5), (loss, ref)

    # Case B: multi-block grid with 2-way core split, partial + empty trailing
    # blocks (forced small tile) and a ragged JAX tail.
    k, key = jax.random.split(key)
    pc, pr, rc, rr = make_inputs(k, 5200)
    loss = jax.block_until_ready(
        dpo_loss(pc, pr, rc, rr, beta=0.1, max_block_rows=12))
    ref = _dpo_loss_ref(pc, pr, rc, rr, beta=0.1)
    assert jnp.allclose(loss, ref, atol=1e-5, rtol=1e-5), (loss, ref)

    # Case C: exact multiple of 1024 -> pure reshape, single exact block, no mask.
    k, key = jax.random.split(key)
    pc, pr, rc, rr = make_inputs(k, 2048)
    loss = jax.block_until_ready(dpo_loss(pc, pr, rc, rr, beta=0.25))
    ref = _dpo_loss_ref(pc, pr, rc, rr, beta=0.25)
    assert jnp.allclose(loss, ref, atol=1e-5, rtol=1e-5), (loss, ref)

    print("KERNEL_OK")
</pallas_src>

<mosaic_0001>
module attributes {stable_mosaic.version = 11 : i64} {
  func.func @kernel(%arg0: i32, %arg1: i32, %arg2: memref<1xf32, #tpu.memory_space<smem>>, %arg3: memref<8x128xf32, #tpu.memory_space<vmem>>, %arg4: memref<8x128xf32, #tpu.memory_space<vmem>>, %arg5: memref<8x128xf32, #tpu.memory_space<vmem>>, %arg6: memref<8x128xf32, #tpu.memory_space<vmem>>, %arg7: memref<8x128xf32, #tpu.memory_space<vmem>>) attributes {dimension_semantics = [#tpu.dimension_semantics<parallel>, #tpu.dimension_semantics<arbitrary>], iteration_bounds = array<i64: 1, 1>, scalar_prefetch = 0 : i64, scratch_operands = 0 : i64, tpu.core_type = #tpu.core_type<tc>, window_params = [{transform_indices = @transform_0, window_bounds = array<i64: 1>}, {transform_indices = @transform_1, window_bounds = array<i64: 8, 128>}, {transform_indices = @transform_2, window_bounds = array<i64: 8, 128>}, {transform_indices = @transform_3, window_bounds = array<i64: 8, 128>}, {transform_indices = @transform_4, window_bounds = array<i64: 8, 128>}, {transform_indices = @transform_5, window_bounds = array<i64: 8, 128>}]} {
    %c0_i32 = arith.constant 0 : i32
    %0 = arith.cmpi eq, %arg1, %c0_i32 : i32
    %1 = arith.extui %0 : i1 to i32
    %c0_i32_0 = arith.constant 0 : i32
    %2 = arith.cmpi ne, %1, %c0_i32_0 : i32
    scf.if %2 {
      %cst_14 = arith.constant 0.000000e+00 : f32
      %33 = vector.broadcast %cst_14 : f32 to vector<8x128xf32>
      %c0_15 = arith.constant 0 : index
      %c0_16 = arith.constant 0 : index
      %34 = vector.load %arg7[%c0_15, %c0_16] : memref<8x128xf32, #tpu.memory_space<vmem>>, vector<8x128xf32>
      tpu.vector_store %arg7[%c0_15, %c0_16], %33 {strides = array<i32>} : memref<8x128xf32, #tpu.memory_space<vmem>>, vector<8x128xf32>,
    } else {
    }
    %c0 = arith.constant 0 : index
    %3 = memref.load %arg2[%c0] : memref<1xf32, #tpu.memory_space<smem>>
    %c0_1 = arith.constant 0 : index
    %c0_2 = arith.constant 0 : index
    %4 = vector.load %arg3[%c0_1, %c0_2] : memref<8x128xf32, #tpu.memory_space<vmem>>, vector<8x128xf32>
    %c0_3 = arith.constant 0 : index
    %c0_4 = arith.constant 0 : index
    %5 = vector.load %arg5[%c0_3, %c0_4] : memref<8x128xf32, #tpu.memory_space<vmem>>, vector<8x128xf32>
    %6 = arith.subf %4, %5 : vector<8x128xf32>
    %c0_5 = arith.constant 0 : index
    %c0_6 = arith.constant 0 : index
    %7 = vector.load %arg4[%c0_5, %c0_6] : memref<8x128xf32, #tpu.memory_space<vmem>>, vector<8x128xf32>
    %c0_7 = arith.constant 0 : index
    %c0_8 = arith.constant 0 : index
    %8 = vector.load %arg6[%c0_7, %c0_8] : memref<8x128xf32, #tpu.memory_space<vmem>>, vector<8x128xf32>
    %9 = arith.subf %7, %8 : vector<8x128xf32>
    %10 = arith.subf %6, %9 : vector<8x128xf32>
    %11 = vector.broadcast %3 : f32 to vector<8x128xf32>
    %12 = arith.mulf %11, %10 : vector<8x128xf32>
    %cst = arith.constant 0.000000e+00 : f32
    %13 = vector.broadcast %cst : f32 to vector<8x128xf32>
    %14 = arith.subf %13, %12 : vector<8x128xf32>
    %cst_9 = arith.constant 0.000000e+00 : f32
    %15 = vector.broadcast %cst_9 : f32 to vector<8x128xf32>
    %16 = arith.maximumf %14, %15 : vector<8x128xf32>
    %17 = math.absf %12 : vector<8x128xf32>
    %cst_10 = arith.constant 0.000000e+00 : f32
    %18 = vector.broadcast %cst_10 : f32 to vector<8x128xf32>
    %19 = arith.subf %18, %17 : vector<8x128xf32>
    %20 = math.exp %19 : vector<8x128xf32>
    %21 = math.log1p %20 : vector<8x128xf32>
    %22 = arith.addf %16, %21 : vector<8x128xf32>
    %c1_i32 = arith.constant 1 : i32
    %23 = arith.muli %arg0, %c1_i32 : i32
    %24 = arith.addi %23, %arg1 : i32
    %c1_i32_11 = arith.constant 1 : i32
    %25 = arith.addi %24, %c1_i32_11 : i32
    %c1024_i32 = arith.constant 1024 : i32
    %26 = arith.muli %25, %c1024_i32 : i32
    %c300_i32 = arith.constant 300 : i32
    %27 = arith.cmpi sgt, %26, %c300_i32 : i32
    %true = arith.constant true
    %28 = arith.xori %27, %true : i1
    %29 = arith.extui %28 : i1 to i32
    %c0_i32_12 = arith.constant 0 : i32
    %30 = arith.cmpi ne, %29, %c0_i32_12 : i32
    scf.if %30 {
      %c0_14 = arith.constant 0 : index
      %c0_15 = arith.constant 0 : index
      %33 = vector.load %arg7[%c0_14, %c0_15] : memref<8x128xf32, #tpu.memory_space<vmem>>, vector<8x128xf32>
      %34 = vector.shape_cast %22 : vector<8x128xf32> to vector<1x8x128xf32>
      %cst_16 = arith.constant dense<0.000000e+00> : vector<8x128xf32>
      %35 = vector.multi_reduction <add>, %34, %cst_16 [0] : vector<1x8x128xf32> to vector<8x128xf32>
      %36 = arith.addf %33, %35 : vector<8x128xf32>
      %c0_17 = arith.constant 0 : index
      %c0_18 = arith.constant 0 : index
      %37 = vector.load %arg7[%c0_17, %c0_18] : memref<8x128xf32, #tpu.memory_space<vmem>>, vector<8x128xf32>
      tpu.vector_store %arg7[%c0_17, %c0_18], %36 {strides = array<i32>} : memref<8x128xf32, #tpu.memory_space<vmem>>, vector<8x128xf32>,
    } else {
    }
    %31 = arith.extui %27 : i1 to i32
    %c0_i32_13 = arith.constant 0 : i32
    %32 = arith.cmpi ne, %31, %c0_i32_13 : i32
    scf.if %32 {
      %33 = tpu.iota {dimensions = array<i32: 0>} : vector<8x128xi32>
      %34 = tpu.iota {dimensions = array<i32: 1>} : vector<8x128xi32>
      %c8_i32 = arith.constant 8 : i32
      %35 = arith.muli %24, %c8_i32 : i32
      %36 = vector.broadcast %35 : i32 to vector<8x128xi32>
      %37 = arith.addi %36, %33 : vector<8x128xi32>
      %c128_i32 = arith.constant 128 : i32
      %38 = vector.broadcast %c128_i32 : i32 to vector<8x128xi32>
      %39 = arith.muli %37, %38 : vector<8x128xi32>
      %40 = arith.addi %39, %34 : vector<8x128xi32>
      %c300_i32_14 = arith.constant 300 : i32
      %41 = vector.broadcast %c300_i32_14 : i32 to vector<8x128xi32>
      %42 = arith.cmpi slt, %40, %41 : vector<8x128xi32>
      %cst_15 = arith.constant 0.000000e+00 : f32
      %43 = vector.broadcast %cst_15 : f32 to vector<8x128xf32>
      %44 = arith.select %42, %22, %43 : vector<8x128xi1>, vector<8x128xf32>
      %c0_16 = arith.constant 0 : index
      %c0_17 = arith.constant 0 : index
      %45 = vector.load %arg7[%c0_16, %c0_17] : memref<8x128xf32, #tpu.memory_space<vmem>>, vector<8x128xf32>
      %46 = vector.shape_cast %44 : vector<8x128xf32> to vector<1x8x128xf32>
      %cst_18 = arith.constant dense<0.000000e+00> : vector<8x128xf32>
      %47 = vector.multi_reduction <add>, %46, %cst_18 [0] : vector<1x8x128xf32> to vector<8x128xf32>
      %48 = arith.addf %45, %47 : vector<8x128xf32>
      %c0_19 = arith.constant 0 : index
      %c0_20 = arith.constant 0 : index
      %49 = vector.load %arg7[%c0_19, %c0_20] : memref<8x128xf32, #tpu.memory_space<vmem>>, vector<8x128xf32>
      tpu.vector_store %arg7[%c0_19, %c0_20], %48 {strides = array<i32>} : memref<8x128xf32, #tpu.memory_space<vmem>>, vector<8x128xf32>,
    } else {
    }
    return
  }
  func.func @transform_0(%arg0: i32, %arg1: i32) -> i32 {
    %c0_i32 = arith.constant 0 : i32
    %c0_i32_0 = arith.constant 0 : i32
    return %c0_i32 : i32
  }
  func.func @transform_1(%arg0: i32, %arg1: i32) -> (i32, i32) {
    %c1_i32 = arith.constant 1 : i32
    %0 = arith.muli %arg0, %c1_i32 : i32
    %1 = arith.addi %0, %arg1 : i32
    %c0_i32 = arith.constant 0 : i32
    %2 = arith.minsi %1, %c0_i32 : i32
    %c0_i32_0 = arith.constant 0 : i32
    %c0_i32_1 = arith.constant 0 : i32
    return %2, %c0_i32_0 : i32, i32
  }
  func.func @transform_2(%arg0: i32, %arg1: i32) -> (i32, i32) {
    %c1_i32 = arith.constant 1 : i32
    %0 = arith.muli %arg0, %c1_i32 : i32
    %1 = arith.addi %0, %arg1 : i32
    %c0_i32 = arith.constant 0 : i32
    %2 = arith.minsi %1, %c0_i32 : i32
    %c0_i32_0 = arith.constant 0 : i32
    %c0_i32_1 = arith.constant 0 : i32
    return %2, %c0_i32_0 : i32, i32
  }
  func.func @transform_3(%arg0: i32, %arg1: i32) -> (i32, i32) {
    %c1_i32 = arith.constant 1 : i32
    %0 = arith.muli %arg0, %c1_i32 : i32
    %1 = arith.addi %0, %arg1 : i32
    %c0_i32 = arith.constant 0 : i32
    %2 = arith.minsi %1, %c0_i32 : i32
    %c0_i32_0 = arith.constant 0 : i32
    %c0_i32_1 = arith.constant 0 : i32
    return %2, %c0_i32_0 : i32, i32
  }
  func.func @transform_4(%arg0: i32, %arg1: i32) -> (i32, i32) {
    %c1_i32 = arith.constant 1 : i32
    %0 = arith.muli %arg0, %c1_i32 : i32
    %1 = arith.addi %0, %arg1 : i32
    %c0_i32 = arith.constant 0 : i32
    %2 = arith.minsi %1, %c0_i32 : i32
    %c0_i32_0 = arith.constant 0 : i32
    %c0_i32_1 = arith.constant 0 : i32
    return %2, %c0_i32_0 : i32, i32
  }
  func.func @transform_5(%arg0: i32, %arg1: i32) -> (i32, i32) {
    %c0_i32 = arith.constant 0 : i32
    %c0_i32_0 = arith.constant 0 : i32
    return %arg0, %c0_i32 : i32, i32
  }
}

</mosaic_0001>

<bundles_post_ra>
// kernel: tpu_custom_call.1
= control target key start
LH: loop header
LB: loop body
LE: loop exit
PB: predicated region body
PF: predicated region fallthrough
CT: control target
= control target key end

     0   :  { %11 = vsyncpa [#allocation4], 0  ;;  %s388_s0 = inlined_call_operand.<no memory space> [shape: f32[1], index: 0, kind: input, shape index: {}]   ;;  %s389_s1 = inlined_call_operand.hbm [shape: f32[8,128], index: 1, kind: input, shape index: {}]   ;;  %s390_s2 = inlined_call_operand.hbm [shape: f32[8,128], index: 2, kind: input, shape index: {}]   ;;  %s391_s3 = inlined_call_operand.vmem [shape: f32[8,128], index: 3, kind: input, shape index: {}]   ;;  %s392_s4 = inlined_call_operand.hbm [shape: f32[8,128], index: 4, kind: input, shape index: {}]   ;;  %s393_s5 = inlined_call_operand.hbm [shape: f32[8,128], index: 5, kind: output, shape index: {}]  }
   0x1   :  { %12 = vsyncpa [#allocation7], 0 }
   0x2   :  { %13 = vsyncpa [#allocation5], 0  ;;  %s300_s18 = smov [#allocation6]   ;;  %s301_s20 = smov [#allocation3]  }
   0x3   :  { %s42_s19 = sshll.u32 %s300_s18, 4  ;;  %s27_s21 = sshll.u32 %s301_s20, 4  ;;  %s43_s19 = int_to_ptr.vmem [resolvable:$true] %s42_s19  ;;  %s28_s21 = int_to_ptr.vmem [resolvable:$true] %s27_s21 }
   0x4   :  { %s206_s24 = scalar_lea.hbm %s390_s2, 128 }
   0x5   :  { %p207_p0 = scmp.ne.s32.totalorder %s390_s2, %s206_s24  ;;  %p210_p1 = scmp.lt.u32.totalorder %s206_s24, %s390_s2 }
   0x7   :  { %p212_p2 = pnand %p210_p1, %p207_p0 }
   0x9   :  { %215 = shalt.err (!%p212_p2)
}
   0xa   :  { %s216_s29 = scalar_lea.vmem %s43_s19, 128  ;;  %p221_p4 = scmp.lt.s32.totalorder %s43_s19, %s43_s19 }
   0xb   :  { %p217_p3 = scmp.ne.s32.totalorder %s43_s19, %s216_s29  ;;  %p222_p5 = scmp.lt.s32.totalorder %s216_s29, %s216_s29 }
   0xd   :  { %p223_p6 = por %p222_p5, %p221_p4 }
   0xf   :  { %p224_p7 = pnand %p223_p6, %p217_p3 }
  0x11   :  { %227 = shalt.err (!%p224_p7)
}
  0x12   :  { %45 = dma.hbm_to_vmem [thread:$0]  %s390_s2, 128, %s43_s19, [#allocation7]  }
  0x13   :  { %s228_s9 = scalar_lea.hbm %s389_s1, 128 }
  0x14   :  { %p229_p8 = scmp.ne.s32.totalorder %s389_s1, %s228_s9  ;;  %p232_p9 = scmp.lt.u32.totalorder %s228_s9, %s389_s1 }
  0x16   :  { %p234_p10 = pnand %p232_p9, %p229_p8 }
  0x18   :  { %237 = shalt.err (!%p234_p10)
}
  0x19   :  { %s238_s14 = scalar_lea.vmem %s28_s21, 128  ;;  %p243_p12 = scmp.lt.s32.totalorder %s28_s21, %s28_s21 }
  0x1a   :  { %p239_p11 = scmp.ne.s32.totalorder %s28_s21, %s238_s14  ;;  %p244_p13 = scmp.lt.s32.totalorder %s238_s14, %s238_s14 }
  0x1c   :  { %p245_p0 = por %p244_p13, %p243_p12 }
  0x1e   :  { %p246_p1 = pnand %p245_p0, %p239_p11 }
  0x20   :  { %249 = shalt.err (!%p246_p1)
}
  0x21   :  { %30 = dma.hbm_to_vmem [thread:$0]  %s389_s1, 128, %s28_s21, [#allocation4]  }
  0x22   :  { %s302_s16 = smov [#allocation8]   ;;  %s250_s20 = scalar_lea.hbm %s392_s4, 128 }
  0x23   :  { %s69_s17 = sshll.u32 %s302_s16, 4  ;;  %p251_p2 = scmp.ne.s32.totalorder %s392_s4, %s250_s20  ;;  %s70_s17 = int_to_ptr.vmem [resolvable:$true] %s69_s17 }
  0x24   :  { %p254_p3 = scmp.lt.u32.totalorder %s250_s20, %s392_s4 }
  0x26   :  { %p256_p4 = pnand %p254_p3, %p251_p2 }
  0x28   :  { %259 = shalt.err (!%p256_p4)
}
  0x29   :  { %s260_s26 = scalar_lea.vmem %s70_s17, 128  ;;  %p265_p6 = scmp.lt.s32.totalorder %s70_s17, %s70_s17 }
  0x2a   :  { %p261_p5 = scmp.ne.s32.totalorder %s70_s17, %s260_s26  ;;  %p266_p7 = scmp.lt.s32.totalorder %s260_s26, %s260_s26 }
  0x2c   :  { %p267_p8 = por %p266_p7, %p265_p6 }
  0x2e   :  { %p268_p9 = pnand %p267_p8, %p261_p5 }
  0x30   :  { %271 = shalt.err (!%p268_p9)
}
  0x31   :  { %72 = dma.hbm_to_vmem [thread:$0]  %s392_s4, 128, %s70_s17, [#allocation7]  }
  0x32   :  { %294 = dma.done.wait [#allocation4], 128  }
  0x33   :  { %295 = vsyncadd [#allocation4], 4294967168 }
  0x34   :  { %296 = dma.done.wait [#allocation7], 256  }
  0x35   :  { %297 = vsyncadd [#allocation7], 4294967040  ;;  %v114_v0 = vld [vmem:[#allocation3] sm:$0xff]  ;;  %v117_v2 = vld [vmem:[#allocation6] sm:$0xff]  ;;  %v121_v6 = vstv %s388_s0  ;;  %v154_v13 = vlaneseq  ;;  %s303_s0 = smov [#allocation9]  }
  0x36   :  { %v115_v1 = vld [vmem:[%s391_s3] sm:$0xff]  ;;  %v118_v4 = vld [vmem:[#allocation8] sm:$0xff]  ;;  %s175_s3 = sshll.u32 %s303_s0, 4  ;;  %s176_s3 = int_to_ptr.vmem [resolvable:$true] %s175_s3 }
  0x37   :  { %v116_v3 = vsub.f32 %v114_v0, %v115_v1  ;;  %v119_v5 = vsub.f32 %v117_v2, %v118_v4  ;;  %v155_v16 = vshrl.u32 %v154_v13, 7  ;;  %v157_v18 = vand.u32 127, %v154_v13  ;;  %s272_s4 = scalar_lea.vmem %s176_s3, 128  ;;  %p277_p11 = scmp.lt.s32.totalorder %s176_s3, %s176_s3 }
  0x38   :  { %p273_p10 = scmp.ne.s32.totalorder %s176_s3, %s272_s4  ;;  %p278_p12 = scmp.lt.s32.totalorder %s272_s4, %s272_s4 }
  0x39   :  { %v120_v7 = vsub.f32 %v116_v3, %v119_v5  ;;  %v161_v19 = vmul.u32 128, %v155_v16 }
  0x3a   :  { %p279_p13 = por %p278_p12, %p277_p11 }
  0x3b   :  { %v122_v8 = vmul.f32 %v121_v6, %v120_v7  ;;  %v162_v23 = vadd.s32 %v161_v19, %v157_v18 }
  0x3c   :  { %p280_p0 = pnand %p279_p13, %p273_p10 }
  0x3d   :  { %v125_v9 = vand.u32 2147483647, %v122_v8  ;;  %v123_v20 = vsub.f32 0.0, %v122_v8  ;;  %vm163_vm1 = vcmp.lt.s32.totalorder %v162_v23, 300 }
  0x3f   :  { %v126_v10 = vsub.f32 0.0, %v125_v9  ;;  %v124_v25 = vmax.f32 %v123_v20, 0.0 }
  0x41   :  { %v127_v11 = vmul.f32 1.442695, %v126_v10 }
  0x43   :  { %202 = vpow2.f32 %v127_v11 }
  0x4d   :  { %v203_v12 = vpop.eup %202 }
  0x4e   :  { %v129_v14 = vadd.f32 1.0, %v203_v12  ;;  %v132_v15 = vmul.f32 -0.5, %v203_v12  ;;  %v135_v21 = vand.u32 2147483647, %v203_v12 }
  0x50   :  { %204 = vlog2.f32 %v129_v14  ;;  %v133_v17 = vadd.f32 1.0, %v132_v15  ;;  %vm136_vm0 = vcmp.lt.f32.partialorder %v135_v21, 0.0004427343 }
  0x52   :  { %v134_v22 = vmul.f32 %v203_v12, %v133_v17 }
  0x5a   :  { %v205_v24 = vpop.eup %204 }
  0x5b   :  { %v131_v26 = vmul.f32 0.6931472, %v205_v24 }
  0x5d   :  { %v137_v27 = vsel %vm136_vm0, %v134_v22, %v131_v26 }
  0x5e   :  { %v138_v28 = vadd.f32 %v137_v27, %v124_v25 }
  0x60   :  { %v164_v29 = vsel %vm163_vm1, %v138_v28, 0.0 }
  0x61   :  { %168 = vst [vmem:[#allocation9] sm:$0xff] %v164_v29 }
  0x62   :  { %283 = shalt.err (!%p280_p0)
}
  0x63   :  { %s284_s8 = scalar_lea.hbm %s393_s5, 128 }
  0x64   :  { %p285_p1 = scmp.ne.s32.totalorder %s393_s5, %s284_s8  ;;  %p288_p2 = scmp.lt.u32.totalorder %s284_s8, %s393_s5 }
  0x66   :  { %p290_p3 = pnand %p288_p2, %p285_p1 }
  0x68   :  { %293 = shalt.err (!%p290_p3)
}
  0x69   :  { %178 = dma.vmem_to_hbm [thread:$0]  %s176_s3, 128, %s393_s5, [#allocation5]  }
  0x6a   :  { %298 = dma.done.wait [#allocation5], 128  }
  0x6b   :  { %299 = vsyncadd [#allocation5], 4294967168 }
  0x6c   :  { %182 = vsyncpa [#allocation4], 1 }
  0x6d   :  { %183 = vsyncpa [#allocation7], 1 }
  0x6e   :  { %184 = vsyncpa [#allocation5], 1 }

</bundles_post_ra>
